<compile_context>
chip_gen: v5e
topology: v5e:2x2
jax: 0.10.0
libtpu: 0.0.40
codegen_flags: <defaults>
</compile_context>

<pallas_src>
from functools import partial

import jax
import jax.numpy as jnp
from jax.experimental import pallas as pl
from jax.experimental.pallas import tpu as pltpu

# 3x3 window offsets, flattened row-major exactly like F.unfold(kernel=3, pad=1)
_OFFSETS = [(-1, -1), (-1, 0), (-1, 1),
            (0, -1),  (0, 0),  (0, 1),
            (1, -1),  (1, 0),  (1, 1)]


def _vmem_budget_bytes():
    """(compute-buffer budget, vmem_limit_bytes), sized per TPU generation."""
    phys = 128 * 1024 * 1024
    try:
        phys = int(getattr(pltpu.get_tpu_info(), "vmem_capacity_bytes", phys))
    except Exception:
        pass  # non-TPU / older API: keep the conservative default
    if phys <= 64 * 1024 * 1024:                  # v7x-class: 64 MiB physical
        return 24 * 1024 * 1024, 32 * 1024 * 1024
    return 48 * 1024 * 1024, 64 * 1024 * 1024     # v5e / v6e: 128 MiB physical


def _choose_num_planes(n_planes, plane_elems, *, io_itemsize, compute_itemsize,
                       n_masked, vmem_budget, min_steps=4, align=8):
    """Planes per grid step.

    Per plane element: input dbuf (2x) + output dbuf (2x) at the I/O dtype plus
    ~6 live compute-dtype temporaries of the iteration body.  Fixed residents:
    the (1, L) column row (sublane-padded to 8 and double-buffered) and the
    (1, L) boundary masks.  T is capped so >= min_steps grid steps exist when
    N permits (v7x needs >= 2 to shard across both TensorCores).
    """
    per_elem = 4 * io_itemsize + 6 * compute_itemsize
    per_plane = per_elem * plane_elems
    fixed = 2 * 8 * plane_elems * 4 + n_masked * plane_elems * compute_itemsize
    cap = max(vmem_budget - fixed, per_plane) // max(per_plane, 1)
    cap = max(align, (cap // align) * align)
    if n_planes >= min_steps * align:
        cap = min(cap, max(align, ((n_planes // min_steps) // align) * align))
    if n_planes <= cap:
        return n_planes
    t = cap
    while t >= align:                             # largest 8-aligned divisor
        if n_planes % t == 0:
            return t
        t -= align
    # TODO(synk): N with no 8-aligned divisor <= cap: single-block fallback
    # (correct, but may exceed the VMEM budget for very large N*L).
    return n_planes


def _soft_morph_kernel(col_ref, x_ref, o_ref, *, offsets, max_iter, H, W, L,
                       compute_dtype):
    """One grid step: T flattened planes, all max_iter iterations in VMEM.

    col_ref: (1, L) f32  column index of every flattened pixel
    x_ref  : (T, L)      input planes (row-major flattened H*W)
    o_ref  : (T, L)      output planes
    """
    cd = compute_dtype
    x = x_ref[...].astype(cd)

    # ---- boundary masks: built once per grid step, outside the hot loop ----
    lane = jax.lax.broadcasted_iota(jnp.int32, (1, L), 1)   # flat pixel index
    col = col_ref[...]                                      # (1, L) f32 column
    base = {
        (-1, 0): (lane >= W).astype(cd),                    # row >= 1
        (1, 0):  (lane < (H - 1) * W).astype(cd),           # row <= H-2
        (0, -1): (col >= 1.0).astype(cd),                   # col >= 1
        (0, 1):  (col <= float(W - 2)).astype(cd),          # col <= W-2
    }
    masks = {}                                 # keyed by offset: pairing-safe
    for (dy, dx) in offsets:
        if (dy, dx) == (0, 0):
            continue
        m = base[(dy, 0)] if dy != 0 else None
        if dx != 0:
            m = base[(0, dx)] if m is None else m * base[(0, dx)]
        masks[(dy, dx)] = m                    # (1, L); broadcasts in the mul

    need_e = any(dx == 1 for (_, dx) in offsets)
    need_w = any(dx == -1 for (_, dx) in offsets)

    def one_step(v):
        # dx bases: the only true arbitrary lane rotations (XLU); the dy
        # offsets are +/-W rolls on top (vreg-granular when W % 128 == 0).
        bases = {0: v}
        if need_e:
            bases[1] = pltpu.roll(v, (L - 1) % L, axis=1)    # nb[p] = v[p + 1]
        if need_w:
            bases[-1] = pltpu.roll(v, 1 % L, axis=1)         # nb[p] = v[p - 1]
        terms = []
        for (dy, dx) in offsets:
            nb = bases[dx]
            if dy != 0:
                nb = pltpu.roll(nb, (-dy * W) % L, axis=1)   # v[p + dy*W + dx]
            m = masks.get((dy, dx))
            if m is not None:
                nb = nb * m                    # zero the wrapped (halo) pixels
            terms.append(1.0 - nb)
        while len(terms) > 1:                  # tree-reduce the product chain
            nxt = [terms[i] * terms[i + 1] for i in range(0, len(terms) - 1, 2)]
            if len(terms) % 2:
                nxt.append(terms[-1])
            terms = nxt
        return (1.0 - terms[0]).astype(cd)     # soft dilation over the SE

    y = jax.lax.fori_loop(0, max_iter, lambda _, v: one_step(v), x,
                          unroll=(max_iter <= 4))
    o_ref[...] = y.astype(o_ref.dtype)


class SoftMorphOperator2D:
    """JAX/Pallas re-implementation of the PyTorch base class (soft dilation)."""

    def __init__(self, indices_list, max_iter=1, connectivity=4,
                 compute_dtype=jnp.float32, validate_range=False):
        self._indices_list = tuple(int(i) for i in indices_list)
        if not self._indices_list:
            raise ValueError("indices_list must be non-empty.")
        if any(i < 0 or i > 8 for i in self._indices_list):
            raise ValueError("indices_list entries must be in [0, 8].")
        self._max_iter = int(max_iter)
        self._connectivity = int(connectivity)
        self._compute_dtype = jnp.dtype(compute_dtype)
        # Range check forces a device->host sync; opt-in only (perf).
        self._validate_range = bool(validate_range)
        self._col_cache = {}

    # ---- input validation (mirrors torch test_format) ----------------------
    def test_format(self, img):
        dim = img.ndim
        size = img.shape
        if dim > 4 or dim < 2:
            raise Exception(
                f"Invalid input shape {size}. Expected [batch_size, channels, "
                f"height, width] or [height, width].")
        elif dim < 4:
            if dim == 3 and size[0] > 3:
                raise Exception(
                    f"Ambiguous input shape {size}. Expected [batch_size, "
                    f"channels, height, width] or [height, width].")
            for _ in range(4 - dim):
                img = img[None, ...]
            print("Image resized to: ", img.shape)
        if self._validate_range:   # guarded: blocking device sync
            if float(jnp.min(img)) < 0.0 or float(jnp.max(img)) > 1.0:
                raise ValueError("Input image values must be in the range [0, 1].")
        if self._connectivity not in (4, 8):
            raise ValueError("Connectivity should either be 4 or 8.")
        return img

    # ---- single (1, L) f32 column-index row, cached per (H, W) --------------
    def _col_index(self, H, W):
        key = (H, W)
        c = self._col_cache.get(key)
        if c is None:
            c = (jnp.arange(H * W, dtype=jnp.int32) % W).astype(jnp.float32)
            c = c.reshape(1, H * W)
            self._col_cache[key] = c
        return c

    # ---- forward ------------------------------------------------------------
    def forward(self, img):
        img = self.test_format(img)
        B, C, H, W = img.shape
        N, L = B * C, H * W
        dtype = img.dtype

        x = img.reshape(N, L)                       # contiguous -> free reshape
        col = self._col_index(H, W)                 # (1, L) f32
        offsets = tuple(_OFFSETS[k] for k in self._indices_list)
        n_masked = sum(1 for o in offsets if o != (0, 0))

        budget, vmem_limit = _vmem_budget_bytes()
        T = _choose_num_planes(
            N, L,
            io_itemsize=jnp.dtype(dtype).itemsize,
            compute_itemsize=self._compute_dtype.itemsize,
            n_masked=n_masked,
            vmem_budget=budget)

        kernel = partial(_soft_morph_kernel, offsets=offsets,
                         max_iter=self._max_iter, H=H, W=W, L=L,
                         compute_dtype=self._compute_dtype)

        cost = pl.CostEstimate(
            flops=3 * len(offsets) * self._max_iter * N * L,
            transcendentals=0,
            bytes_accessed=2 * N * L * jnp.dtype(dtype).itemsize + 4 * L)

        out = pl.pallas_call(
            kernel,
            out_shape=jax.ShapeDtypeStruct((N, L), dtype),
            grid_spec=pltpu.PrefetchScalarGridSpec(
                num_scalar_prefetch=0,
                grid=(N // T,),
                in_specs=[
                    pl.BlockSpec((1, L), lambda i: (0, 0)),   # column row
                    pl.BlockSpec((T, L), lambda i: (i, 0)),   # planes in
                ],
                out_specs=pl.BlockSpec((T, L), lambda i: (i, 0)),
            ),
            compiler_params=pltpu.CompilerParams(
                dimension_semantics=("parallel",),
                vmem_limit_bytes=vmem_limit),
            cost_estimate=cost,
        )(col, x)

        return out.reshape(B, C, H, W)

    __call__ = forward


# ---- pure-JAX reference (F.unfold-style, zero halo) for validation ----------
def _reference_soft_dilation(img, indices, max_iter):
    x = img.astype(jnp.float32)
    B, C, H, W = x.shape
    for _ in range(max_iter):
        xp = jnp.pad(x, ((0, 0), (0, 0), (1, 1), (1, 1)))
        prod = jnp.ones_like(x)
        for k in indices:
            dy, dx = _OFFSETS[k]
            prod = prod * (1.0 - xp[:, :, 1 + dy:1 + dy + H, 1 + dx:1 + dx + W])
        x = 1.0 - prod
    return x


if __name__ == "__main__":
    key = jax.random.PRNGKey(0)
    x = jax.random.uniform(key, (2, 4, 16, 16), dtype=jnp.float32,
                           minval=0.0, maxval=1.0)

    # connectivity=4 -> cross SE, 2 iterations (fori_loop path, row/col masks)
    idx4 = [1, 3, 4, 5, 7]
    op4 = SoftMorphOperator2D(indices_list=idx4, max_iter=2, connectivity=4)
    y4 = op4(x)
    jax.block_until_ready(y4)
    assert y4.shape == x.shape and y4.dtype == x.dtype
    assert float(jnp.min(y4)) >= 0.0 and float(jnp.max(y4)) <= 1.0
    ref4 = _reference_soft_dilation(x, idx4, max_iter=2)
    err4 = float(jnp.max(jnp.abs(y4.astype(jnp.float32) - ref4)))
    assert err4 < 1e-5, f"conn4 max abs err {err4}"

    # connectivity=8 -> full 3x3 SE, 1 iteration (exercises diagonal masks)
    idx8 = list(range(9))
    op8 = SoftMorphOperator2D(indices_list=idx8, max_iter=1, connectivity=8)
    y8 = op8(x)
    jax.block_until_ready(y8)
    ref8 = _reference_soft_dilation(x, idx8, max_iter=1)
    err8 = float(jnp.max(jnp.abs(y8.astype(jnp.float32) - ref8)))
    assert err8 < 1e-5, f"conn8 max abs err {err8}"

    print("KERNEL_OK")
</pallas_src>

<mosaic_0001>
module attributes {stable_mosaic.version = 11 : i64} {
  func.func @_soft_morph_kernel(%arg0: i32, %arg1: memref<1x256xf32, #tpu.memory_space<vmem>>, %arg2: memref<8x256xf32, #tpu.memory_space<vmem>>, %arg3: memref<8x256xf32, #tpu.memory_space<vmem>>) attributes {dimension_semantics = [#tpu.dimension_semantics<parallel>], iteration_bounds = array<i64: 1>, scalar_prefetch = 0 : i64, scratch_operands = 0 : i64, tpu.core_type = #tpu.core_type<tc>, window_params = [{pipeline_mode = #tpu.pipeline_mode<synchronous>, transform_indices = @transform_0, window_bounds = array<i64: 1, 256>}, {transform_indices = @transform_1, window_bounds = array<i64: 8, 256>}, {transform_indices = @transform_2, window_bounds = array<i64: 8, 256>}]} {
    %c0 = arith.constant 0 : index
    %c0_0 = arith.constant 0 : index
    %0 = vector.load %arg2[%c0, %c0_0] : memref<8x256xf32, #tpu.memory_space<vmem>>, vector<8x256xf32>
    %1 = tpu.iota {dimensions = array<i32: 1>} : vector<1x256xi32>
    %c0_1 = arith.constant 0 : index
    %c0_2 = arith.constant 0 : index
    %2 = vector.load %arg1[%c0_1, %c0_2] : memref<1x256xf32, #tpu.memory_space<vmem>>, vector<1x256xf32>
    %c16_i32 = arith.constant 16 : i32
    %3 = vector.broadcast %c16_i32 : i32 to vector<1x256xi32>
    %4 = arith.cmpi sge, %1, %3 : vector<1x256xi32>
    %5 = arith.extui %4 : vector<1x256xi1> to vector<1x256xi32>
    %6 = arith.sitofp %5 : vector<1x256xi32> to vector<1x256xf32>
    %c240_i32 = arith.constant 240 : i32
    %7 = vector.broadcast %c240_i32 : i32 to vector<1x256xi32>
    %8 = arith.cmpi slt, %1, %7 : vector<1x256xi32>
    %9 = arith.extui %8 : vector<1x256xi1> to vector<1x256xi32>
    %10 = arith.sitofp %9 : vector<1x256xi32> to vector<1x256xf32>
    %cst = arith.constant 1.000000e+00 : f32
    %11 = vector.broadcast %cst : f32 to vector<1x256xf32>
    %12 = arith.cmpf oge, %2, %11 : vector<1x256xf32>
    %13 = arith.extui %12 : vector<1x256xi1> to vector<1x256xi32>
    %14 = arith.sitofp %13 : vector<1x256xi32> to vector<1x256xf32>
    %cst_3 = arith.constant 1.400000e+01 : f32
    %15 = vector.broadcast %cst_3 : f32 to vector<1x256xf32>
    %16 = arith.cmpf ole, %2, %15 : vector<1x256xf32>
    %17 = arith.extui %16 : vector<1x256xi1> to vector<1x256xi32>
    %18 = arith.sitofp %17 : vector<1x256xi32> to vector<1x256xf32>
    %c0_i32 = arith.constant 0 : i32
    %c255_i32 = arith.constant 255 : i32
    %19 = tpu.dynamic_rotate %0 by %c255_i32 dim 1 : vector<8x256xf32>, i32 -> vector<8x256xf32>
    %c1_i32 = arith.constant 1 : i32
    %20 = tpu.dynamic_rotate %0 by %c1_i32 dim 1 : vector<8x256xf32>, i32 -> vector<8x256xf32>
    %c16_i32_4 = arith.constant 16 : i32
    %21 = tpu.dynamic_rotate %0 by %c16_i32_4 dim 1 : vector<8x256xf32>, i32 -> vector<8x256xf32>
    %22 = vector.broadcast %6 : vector<1x256xf32> to vector<8x256xf32>
    %23 = arith.mulf %21, %22 : vector<8x256xf32>
    %cst_5 = arith.constant 1.000000e+00 : f32
    %24 = vector.broadcast %cst_5 : f32 to vector<8x256xf32>
    %25 = arith.subf %24, %23 : vector<8x256xf32>
    %26 = vector.broadcast %14 : vector<1x256xf32> to vector<8x256xf32>
    %27 = arith.mulf %20, %26 : vector<8x256xf32>
    %cst_6 = arith.constant 1.000000e+00 : f32
    %28 = vector.broadcast %cst_6 : f32 to vector<8x256xf32>
    %29 = arith.subf %28, %27 : vector<8x256xf32>
    %cst_7 = arith.constant 1.000000e+00 : f32
    %30 = vector.broadcast %cst_7 : f32 to vector<8x256xf32>
    %31 = arith.subf %30, %0 : vector<8x256xf32>
    %32 = vector.broadcast %18 : vector<1x256xf32> to vector<8x256xf32>
    %33 = arith.mulf %19, %32 : vector<8x256xf32>
    %cst_8 = arith.constant 1.000000e+00 : f32
    %34 = vector.broadcast %cst_8 : f32 to vector<8x256xf32>
    %35 = arith.subf %34, %33 : vector<8x256xf32>
    %c240_i32_9 = arith.constant 240 : i32
    %36 = tpu.dynamic_rotate %0 by %c240_i32_9 dim 1 : vector<8x256xf32>, i32 -> vector<8x256xf32>
    %37 = vector.broadcast %10 : vector<1x256xf32> to vector<8x256xf32>
    %38 = arith.mulf %36, %37 : vector<8x256xf32>
    %cst_10 = arith.constant 1.000000e+00 : f32
    %39 = vector.broadcast %cst_10 : f32 to vector<8x256xf32>
    %40 = arith.subf %39, %38 : vector<8x256xf32>
    %41 = arith.mulf %25, %29 : vector<8x256xf32>
    %42 = arith.mulf %31, %35 : vector<8x256xf32>
    %43 = arith.mulf %41, %42 : vector<8x256xf32>
    %44 = arith.mulf %43, %40 : vector<8x256xf32>
    %cst_11 = arith.constant 1.000000e+00 : f32
    %45 = vector.broadcast %cst_11 : f32 to vector<8x256xf32>
    %46 = arith.subf %45, %44 : vector<8x256xf32>
    %c1_i32_12 = arith.constant 1 : i32
    %c255_i32_13 = arith.constant 255 : i32
    %47 = tpu.dynamic_rotate %46 by %c255_i32_13 dim 1 : vector<8x256xf32>, i32 -> vector<8x256xf32>
    %c1_i32_14 = arith.constant 1 : i32
    %48 = tpu.dynamic_rotate %46 by %c1_i32_14 dim 1 : vector<8x256xf32>, i32 -> vector<8x256xf32>
    %c16_i32_15 = arith.constant 16 : i32
    %49 = tpu.dynamic_rotate %46 by %c16_i32_15 dim 1 : vector<8x256xf32>, i32 -> vector<8x256xf32>
    %50 = vector.broadcast %6 : vector<1x256xf32> to vector<8x256xf32>
    %51 = arith.mulf %49, %50 : vector<8x256xf32>
    %cst_16 = arith.constant 1.000000e+00 : f32
    %52 = vector.broadcast %cst_16 : f32 to vector<8x256xf32>
    %53 = arith.subf %52, %51 : vector<8x256xf32>
    %54 = vector.broadcast %14 : vector<1x256xf32> to vector<8x256xf32>
    %55 = arith.mulf %48, %54 : vector<8x256xf32>
    %cst_17 = arith.constant 1.000000e+00 : f32
    %56 = vector.broadcast %cst_17 : f32 to vector<8x256xf32>
    %57 = arith.subf %56, %55 : vector<8x256xf32>
    %cst_18 = arith.constant 1.000000e+00 : f32
    %58 = vector.broadcast %cst_18 : f32 to vector<8x256xf32>
    %59 = arith.subf %58, %46 : vector<8x256xf32>
    %60 = vector.broadcast %18 : vector<1x256xf32> to vector<8x256xf32>
    %61 = arith.mulf %47, %60 : vector<8x256xf32>
    %cst_19 = arith.constant 1.000000e+00 : f32
    %62 = vector.broadcast %cst_19 : f32 to vector<8x256xf32>
    %63 = arith.subf %62, %61 : vector<8x256xf32>
    %c240_i32_20 = arith.constant 240 : i32
    %64 = tpu.dynamic_rotate %46 by %c240_i32_20 dim 1 : vector<8x256xf32>, i32 -> vector<8x256xf32>
    %65 = vector.broadcast %10 : vector<1x256xf32> to vector<8x256xf32>
    %66 = arith.mulf %64, %65 : vector<8x256xf32>
    %cst_21 = arith.constant 1.000000e+00 : f32
    %67 = vector.broadcast %cst_21 : f32 to vector<8x256xf32>
    %68 = arith.subf %67, %66 : vector<8x256xf32>
    %69 = arith.mulf %53, %57 : vector<8x256xf32>
    %70 = arith.mulf %59, %63 : vector<8x256xf32>
    %71 = arith.mulf %69, %70 : vector<8x256xf32>
    %72 = arith.mulf %71, %68 : vector<8x256xf32>
    %cst_22 = arith.constant 1.000000e+00 : f32
    %73 = vector.broadcast %cst_22 : f32 to vector<8x256xf32>
    %74 = arith.subf %73, %72 : vector<8x256xf32>
    %c0_23 = arith.constant 0 : index
    %c0_24 = arith.constant 0 : index
    %75 = vector.load %arg3[%c0_23, %c0_24] : memref<8x256xf32, #tpu.memory_space<vmem>>, vector<8x256xf32>
    tpu.vector_store %arg3[%c0_23, %c0_24], %74 {strides = array<i32>} : memref<8x256xf32, #tpu.memory_space<vmem>>, vector<8x256xf32>,
    return
  }
  func.func @transform_0(%arg0: i32) -> (i32, i32) {
    %c0_i32 = arith.constant 0 : i32
    %c0_i32_0 = arith.constant 0 : i32
    %c0_i32_1 = arith.constant 0 : i32
    return %c0_i32, %c0_i32_0 : i32, i32
  }
  func.func @transform_1(%arg0: i32) -> (i32, i32) {
    %c0_i32 = arith.constant 0 : i32
    %c0_i32_0 = arith.constant 0 : i32
    return %arg0, %c0_i32 : i32, i32
  }
  func.func @transform_2(%arg0: i32) -> (i32, i32) {
    %c0_i32 = arith.constant 0 : i32
    %c0_i32_0 = arith.constant 0 : i32
    return %arg0, %c0_i32 : i32, i32
  }
}

</mosaic_0001>

<bundles_post_ra>
// kernel: tpu_custom_call.1
= control target key start
LH: loop header
LB: loop body
LE: loop exit
PB: predicated region body
PF: predicated region fallthrough
CT: control target
= control target key end

     0   :  { %7 = vsyncpa [#allocation3], 0  ;;  %s404_s0 = inlined_call_operand.hbm [shape: f32[1,256], index: 0, kind: input, shape index: {}]   ;;  %s405_s1 = inlined_call_operand.hbm [shape: f32[8,256], index: 1, kind: input, shape index: {}]   ;;  %s406_s2 = inlined_call_operand.hbm [shape: f32[8,256], index: 2, kind: output, shape index: {}]  }
   0x1   :  { %8 = vsyncpa [#allocation6], 0 }
   0x2   :  { %9 = vsyncpa [#allocation4], 0  ;;  %s15_s11 = sshll.u32 %s404_s0, 4  ;;  %s292_s12 = smov [#allocation2]   ;;  %s16_s11 = int_to_ptr.hbm [resolvable:$true] %s15_s11 }
   0x3   :  { %s17_s13 = sshll.u32 %s292_s12, 4  ;;  %s26_s16 = sshll.u32 %s405_s1, 4  ;;  %s18_s13 = int_to_ptr.vmem [resolvable:$true] %s17_s13  ;;  %s27_s16 = int_to_ptr.hbm [resolvable:$true] %s26_s16 }
   0x4   :  { %20 = dma.hbm_to_vmem [thread:$0]  %s16_s11, 32, %s18_s13, [#allocation3]  }
   0x5   :  { %s293_s17 = smov [#allocation5]  }
   0x6   :  { %s28_s18 = sshll.u32 %s293_s17, 4  ;;  %s29_s18 = int_to_ptr.vmem [resolvable:$true] %s28_s18 }
   0x7   :  { %31 = dma.hbm_to_vmem [thread:$0]  %s27_s16, 256, %s29_s18, [#allocation6]  }
   0x8   :  { %286 = dma.done.wait [#allocation3], 32  }
   0x9   :  { %287 = vsyncadd [#allocation3], 4294967264 }
   0xa   :  { %288 = dma.done.wait [#allocation6], 256  }
   0xb   :  { %289 = vsyncadd [#allocation6], 4294967040  ;;  %v40_v0 = vld [vmem:[#allocation5] sm:$0xff]  ;;  %s294_s0 = smov 1   ;;  %s295_s19 = smov 127   ;;  %v41_v1 = vld [vmem:[#allocation5 + $0x8] sm:$0xff]  ;;  %v42_v3 = vlaneseq }
   0xc   :  { %71 = vrot.lane.b32.xlu1 %v40_v0, %s294_s0  ;;  %64 = vrot.lane.b32.xlu0 %v40_v0, %s295_s19  ;;  %s296_s20 = smov 16   ;;  %s297_s1 = smov 112   ;;  %v45_v4 = vld [vmem:[#allocation2] sm:$0x3]  ;;  %v298_v9 = vmov 0.0   ;;  %v98_v22 = vsub.f32 1.0, %v40_v0 }
   0xd   :  { %78 = vrot.lane.b32.xlu2 %v40_v0, %s296_s20  ;;  %v329_v5 = vand.u32 127, %v42_v3  ;;  %vm58_vm0 = vcmp.ge.f32.partialorder %v45_v4, 1.0  ;;  %vm61_vm1 = vcmp.le.f32.partialorder %v45_v4, 14.0  ;;  %v99_v33 = vsub.f32 1.0, %v41_v1  ;;  %s299_s21 = smov [#allocation7]   ;;  %s191_s25 = sshll.u32 %s406_s2, 4  ;;  %s192_s25 = int_to_ptr.hbm [resolvable:$true] %s191_s25 }
   0xe   :  { %v333_v10 = vsel %vm58_vm0, 1.0, %v298_v9  ;;  %v335_v11 = vsel %vm61_vm1, 1.0, %v298_v9  ;;  %s189_s22 = sshll.u32 %s299_s21, 4  ;;  %s190_s22 = int_to_ptr.vmem [resolvable:$true] %s189_s22 }
   0xf   :  { %vm46_vm2 = vcmp.ge.s32.totalorder %v329_v5, 16  ;;  %vm82_vm3 = vcmp.lt.s32.totalorder %v329_v5, 16  ;;  %v90_v14 = vperm.slane %v333_v10, 0  ;;  %v91_v15 = vperm.slane %v333_v10, 1 }
  0x10   :  { %v337_v12 = vsel %vm46_vm2, 1.0, %v298_v9  ;;  %vm75_vm4 = vcmp.lt.s32.totalorder %v329_v5, 1  ;;  %vm68_vm5 = vcmp.lt.s32.totalorder %v329_v5, 127  ;;  %v101_v16 = vperm.slane %v335_v11, 0 }
  0x11   :  { %v102_v17 = vperm.slane %v335_v11, 1  ;;  %v44_v19 = vadd.s32 128, %v329_v5  ;;  %vm113_vm7 = vcmp.lt.s32.totalorder %v329_v5, 112 }
  0x13   :  { %vm53_vm6 = vcmp.lt.s32.totalorder %v44_v19, 240 }
  0x14   :  { %73 = vrot.lane.b32.xlu1 %v41_v1, %s294_s0  ;;  %66 = vrot.lane.b32.xlu0 %v41_v1, %s295_s19  ;;  %v203_v41 = vsel %vm53_vm6, 1.0, %v298_v9 }
  0x15   :  { %80 = vrot.lane.b32.xlu2 %v41_v1, %s296_s20 }
  0x1c   :  { %111 = vrot.lane.b32.xlu1 %v41_v1, %s297_s1  ;;  %109 = vrot.lane.b32.xlu0 %v40_v0, %s297_s1 }
  0x67   :  { %v79_v2 = vpop.permute.xlu2 %78 }
  0x6f   :  { %v81_v8 = vpop.permute.xlu2 %80 }
  0x70   :  { %v84_v13 = vsel %vm82_vm3, %v81_v8, %v79_v2  ;;  %v83_v31 = vsel %vm82_vm3, %v79_v2, %v81_v8 }
  0x71   :  { %v85_v18 = vmul.f32 %v337_v12, %v84_v13  ;;  %v88_v38 = vsub.f32 1.0, %v83_v31 }
  0x73   :  { %v87_v32 = vsub.f32 1.0, %v85_v18 }
  0x7e   :  { %v72_v6 = vpop.permute.xlu1 %71  ;;  %v65_v7 = vpop.permute.xlu0 %64 }
  0x86   :  { %v74_v20 = vpop.permute.xlu1 %73  ;;  %v67_v21 = vpop.permute.xlu0 %66 }
  0x87   :  { %v76_v23 = vsel %vm75_vm4, %v72_v6, %v74_v20  ;;  %v77_v24 = vsel %vm75_vm4, %v74_v20, %v72_v6  ;;  %v69_v25 = vsel %vm68_vm5, %v65_v7, %v67_v21  ;;  %v70_v26 = vsel %vm68_vm5, %v67_v21, %v65_v7 }
  0x88   :  { %v94_v27 = vmul.f32 %v90_v14, %v77_v24  ;;  %v95_v28 = vmul.f32 %v91_v15, %v76_v23  ;;  %v105_v29 = vmul.f32 %v101_v16, %v69_v25  ;;  %v106_v30 = vmul.f32 %v102_v17, %v70_v26 }
  0x8a   :  { %v96_v34 = vsub.f32 1.0, %v94_v27  ;;  %v97_v35 = vsub.f32 1.0, %v95_v28  ;;  %v107_v36 = vsub.f32 1.0, %v105_v29  ;;  %v108_v37 = vsub.f32 1.0, %v106_v30 }
  0x8c   :  { %v120_v39 = vmul.f32 %v96_v34, %v87_v32  ;;  %v122_v40 = vmul.f32 %v107_v36, %v98_v22  ;;  %v121_v42 = vmul.f32 %v97_v35, %v88_v38  ;;  %v123_v43 = vmul.f32 %v108_v37, %v99_v33 }
  0x8e   :  { %v112_v44 = vpop.permute.xlu1 %111  ;;  %v110_v45 = vpop.permute.xlu0 %109  ;;  %v124_v50 = vmul.f32 %v122_v40, %v120_v39  ;;  %v125_v51 = vmul.f32 %v123_v43, %v121_v42 }
  0x8f   :  { %v114_v46 = vsel %vm113_vm7, %v110_v45, %v112_v44  ;;  %v115_v47 = vsel %vm113_vm7, %v112_v44, %v110_v45 }
  0x90   :  { %v117_v48 = vmul.f32 %v203_v41, %v115_v47  ;;  %v118_v49 = vsub.f32 1.0, %v114_v46 }
  0x92   :  { %v119_v52 = vsub.f32 1.0, %v117_v48  ;;  %v126_v53 = vmul.f32 %v124_v50, %v118_v49 }
  0x94   :  { %v127_v54 = vmul.f32 %v125_v51, %v119_v52  ;;  %v128_v55 = vsub.f32 1.0, %v126_v53 }
  0x96   :  { %v129_v56 = vsub.f32 1.0, %v127_v54  ;;  %136 = vrot.lane.b32.xlu1 %v128_v55, %s294_s0  ;;  %130 = vrot.lane.b32.xlu2 %v128_v55, %s295_s19  ;;  %v156_v21 = vsub.f32 1.0, %v128_v55 }
  0x98   :  { %132 = vrot.lane.b32.xlu0 %v129_v56, %s295_s19  ;;  %v157_v25 = vsub.f32 1.0, %v129_v56 }
  0x9e   :  { %144 = vrot.lane.b32.xlu1 %v129_v56, %s296_s20  ;;  %138 = vrot.lane.b32.xlu2 %v129_v56, %s294_s0 }
  0xa0   :  { %142 = vrot.lane.b32.xlu0 %v128_v55, %s296_s20 }
  0xa6   :  { %162 = vrot.lane.b32.xlu2 %v128_v55, %s297_s1 }
  0xa8   :  { %164 = vrot.lane.b32.xlu0 %v129_v56, %s297_s1 }
  0xf0   :  { %v131_v57 = vpop.permute.xlu2 %130 }
  0xf8   :  { %v139_v60 = vpop.permute.xlu2 %138 }
 0x100   :  { %v163_v24 = vpop.permute.xlu2 %162 }
 0x108   :  { %v137_v58 = vpop.permute.xlu1 %136 }
 0x109   :  { %v141_v61 = vsel %vm75_vm4, %v139_v60, %v137_v58  ;;  %v140_v63 = vsel %vm75_vm4, %v137_v58, %v139_v60 }
 0x10a   :  { %v133_v59 = vpop.permute.xlu0 %132  ;;  %v152_v1 = vmul.f32 %v141_v61, %v90_v14  ;;  %v153_v8 = vmul.f32 %v140_v63, %v91_v15 }
 0x10b   :  { %v134_v62 = vsel %vm68_vm5, %v131_v57, %v133_v59  ;;  %v135_v0 = vsel %vm68_vm5, %v133_v59, %v131_v57 }
 0x10c   :  { %v158_v2 = vmul.f32 %v134_v62, %v101_v16  ;;  %v159_v9 = vmul.f32 %v135_v0, %v102_v17  ;;  %v154_v18 = vsub.f32 1.0, %v152_v1  ;;  %v155_v20 = vsub.f32 1.0, %v153_v8 }
 0x10e   :  { %v160_v19 = vsub.f32 1.0, %v158_v2  ;;  %v161_v22 = vsub.f32 1.0, %v159_v9 }
 0x110   :  { %v145_v3 = vpop.permute.xlu1 %144  ;;  %v174_v26 = vmul.f32 %v160_v19, %v156_v21 }
 0x112   :  { %v143_v4 = vpop.permute.xlu0 %142 }
 0x113   :  { %v146_v6 = vsel %vm82_vm3, %v143_v4, %v145_v3  ;;  %v147_v7 = vsel %vm82_vm3, %v145_v3, %v143_v4 }
 0x114   :  { %v148_v13 = vmul.f32 %v337_v12, %v147_v7  ;;  %v151_v16 = vsub.f32 1.0, %v146_v6  ;;  %v175_v12 = vmul.f32 %v161_v22, %v157_v25 }
 0x116   :  { %v150_v14 = vsub.f32 1.0, %v148_v13  ;;  %v173_v27 = vmul.f32 %v155_v20, %v151_v16 }
 0x118   :  { %v172_v23 = vmul.f32 %v154_v18, %v150_v14  ;;  %v177_v30 = vmul.f32 %v175_v12, %v173_v27 }
 0x11a   :  { %v165_v28 = vpop.permute.xlu0 %164  ;;  %v176_v29 = vmul.f32 %v174_v26, %v172_v23 }
 0x11b   :  { %v166_v10 = vsel %vm113_vm7, %v163_v24, %v165_v28  ;;  %v167_v11 = vsel %vm113_vm7, %v165_v28, %v163_v24 }
 0x11c   :  { %v169_v15 = vmul.f32 %v203_v41, %v167_v11  ;;  %v170_v17 = vsub.f32 1.0, %v166_v10 }
 0x11e   :  { %v171_v31 = vsub.f32 1.0, %v169_v15  ;;  %v178_v32 = vmul.f32 %v176_v29, %v170_v17 }
 0x120   :  { %v179_v33 = vmul.f32 %v177_v30, %v171_v31  ;;  %v180_v34 = vsub.f32 1.0, %v178_v32 }
 0x122   :  { %v181_v35 = vsub.f32 1.0, %v179_v33  ;;  %182 = vst [vmem:[#allocation7] sm:$0xff] %v180_v34 }
 0x124   :  { %183 = vst [vmem:[#allocation7 + $0x8] sm:$0xff] %v181_v35 }
 0x125   :  { %194 = dma.vmem_to_hbm [thread:$0]  %s190_s22, 256, %s192_s25, [#allocation4]  }
 0x126   :  { %290 = dma.done.wait [#allocation4], 256  }
 0x127   :  { %291 = vsyncadd [#allocation4], 4294967040 }
 0x128   :  { %199 = vsyncpa [#allocation3], 1 }
 0x129   :  { %200 = vsyncpa [#allocation6], 1 }
 0x12a   :  { %201 = vsyncpa [#allocation4], 1 }

</bundles_post_ra>
